<compile_context>
chip_gen: v6e
topology: v6e:2x2x1
jax: 0.10.0
libtpu: 0.0.40
codegen_flags: <defaults>
</compile_context>

<pallas_src>
import jax
import jax.numpy as jnp
from jax import lax
from jax.experimental import pallas as pl
from jax.experimental.pallas import tpu as pltpu

LN_EPS = 1e-5  # torch.nn.functional.layer_norm default eps


def _round_up(x, m):
    return ((x + m - 1) // m) * m


def _layer_norm_axis0(h):
    """LayerNorm over axis 0 (feature/sublane axis), no affine params.

    Two independent reductions (sum, sum-of-squares) so they can overlap
    instead of the serial mean -> mean((h-mu)^2) chain. Matches F.layer_norm's
    biased variance. max(var, 0) keeps padded all-zero columns finite.
    """
    n = h.shape[0]
    inv_n = 1.0 / n
    s1 = jnp.sum(h, axis=0, keepdims=True)
    s2 = jnp.sum(h * h, axis=0, keepdims=True)
    mu = s1 * inv_n
    var = jnp.maximum(s2 * inv_n - mu * mu, 0.0)
    return (h - mu) * lax.rsqrt(var + LN_EPS)


def actor_kernel(x_ref, w1_ref, b1_ref, w2_ref, b2_ref, w3_ref, b3_ref, o_ref):
    # x_ref: (tile_b, input_size)  -- batch-major, straight from HBM (no host transpose)
    # w*:    (out, in), b*: (out, 1) -- whole arrays resident in VMEM
    # o_ref: (output_size, tile_b)   -- feature-major => lane-dense stores
    # Layer 1: contract the 'in' axes of W (out, in) and X (tile_b, in);
    # result is already feature-major (hidden, tile_b). The operand transpose
    # happens on-chip, not as a separate XLA HBM pass.
    h = lax.dot_general(
        w1_ref[...], x_ref[...],
        dimension_numbers=(((1,), (1,)), ((), ())),
        preferred_element_type=jnp.float32,
    ) + b1_ref[...]
    h = _layer_norm_axis0(jnp.maximum(h, 0.0))

    h = jnp.dot(w2_ref[...], h, preferred_element_type=jnp.float32) + b2_ref[...]
    h = _layer_norm_axis0(jnp.maximum(h, 0.0))

    y = jnp.dot(w3_ref[...], h, preferred_element_type=jnp.float32) + b3_ref[...]
    o_ref[...] = jnp.tanh(y).astype(o_ref.dtype)


def actor_forward(state, params, *, tile_b=4096):
    """state: (B, input_size) float32; params: W (out, in) / b (out, 1) arrays (f32)."""
    w1, b1 = params["w1"], params["b1"]
    w2, b2 = params["w2"], params["b2"]
    w3, b3 = params["w3"], params["b3"]

    B, input_size = state.shape
    hidden_size = w1.shape[0]
    output_size = w3.shape[0]

    weight_bytes = sum(int(a.size) * a.dtype.itemsize for a in (w1, b1, w2, b2, w3, b3))

    # ---- batch-tile sizing: amortize per-grid-step pipeline overhead ----------
    # VMEM bytes per batch column: streamed input (lanes padded to 128, double
    # buffered), streamed output (double buffered), ~6 live f32 (hidden, tile_b)
    # temporaries from LN/matmul.
    bytes_per_col = (
        2 * _round_up(input_size, 128) * 4
        + 2 * max(output_size, 8) * 4
        + 6 * max(hidden_size, 8) * 4
    )
    # 40 MiB activation budget is safe on v5e/v6e (128 MiB VMEM) and v7x (64 MiB).
    vmem_budget = 40 << 20
    max_tile_from_vmem = max(((vmem_budget - weight_bytes) // bytes_per_col) // 128 * 128, 128)

    b_ceil = _round_up(B, 128)
    tile_b = max(128, min(_round_up(tile_b, 128), max_tile_from_vmem, b_ceil))

    # v7x megacore: if the whole batch fits in a single grid step but each half
    # would still be >=1024 columns (enough to amortize step overhead), split it
    # into two steps so dimension_semantics=("parallel",) can use both TCs.
    if tile_b == b_ceil and b_ceil >= 2048:
        tile_b = _round_up(b_ceil, 256) // 2

    b_pad = _round_up(B, tile_b)
    x = state if b_pad == B else jnp.pad(state, ((0, b_pad - B), (0, 0)))

    grid = (b_pad // tile_b,)

    vmem_needed = bytes_per_col * tile_b + weight_bytes + (1 << 20)
    # Raise v5e's 16 MiB default scoped limit; stay well below v7x's 64 MiB physical.
    vmem_limit = int(min(48 << 20, max(int(1.5 * vmem_needed), 32 << 20)))

    # Grid-invariant operands: whole array resident in VMEM, DMA'd once, no
    # double-buffer allocation.
    resident = pl.BlockSpec(memory_space=pltpu.MemorySpace.VMEM)
    in_specs = [
        pl.BlockSpec((tile_b, input_size), lambda i: (i, 0)),  # streamed activations
        resident, resident,   # w1, b1
        resident, resident,   # w2, b2
        resident, resident,   # w3, b3
    ]
    out_specs = pl.BlockSpec((output_size, tile_b), lambda i: (0, i))

    cost = pl.CostEstimate(
        flops=2 * b_pad * (input_size * hidden_size
                           + hidden_size * hidden_size
                           + hidden_size * output_size),
        transcendentals=b_pad * (output_size + 2),  # tanh per output + 2 rsqrt per column
        bytes_accessed=b_pad * input_size * 4 + weight_bytes + b_pad * output_size * 4,
    )

    out_t = pl.pallas_call(
        actor_kernel,
        out_shape=jax.ShapeDtypeStruct((output_size, b_pad), jnp.float32),
        grid=grid,
        in_specs=in_specs,
        out_specs=out_specs,
        compiler_params=pltpu.CompilerParams(
            dimension_semantics=("parallel",),  # shard batch tiles across TCs (v7x)
            vmem_limit_bytes=vmem_limit,
        ),
        cost_estimate=cost,
    )(x, w1, b1, w2, b2, w3, b3)

    # Only the tiny (output_size, B) result is transposed back to (B, output_size).
    return out_t[:, :B].T


def init_params(key, input_size, hidden_size, output_size):
    """Deterministic synthetic init (uniform, roughly PyTorch Linear scale).

    Weights stored in PyTorch layout (out_features, in_features); biases (out, 1).
    """
    ks = jax.random.split(key, 6)

    def lin(kw, kb, fan_in, fan_out):
        bound = 1.0 / jnp.sqrt(fan_in)
        w = jax.random.uniform(kw, (fan_out, fan_in), jnp.float32, -bound, bound)
        b = jax.random.uniform(kb, (fan_out, 1), jnp.float32, -bound, bound)
        return w, b

    w1, b1 = lin(ks[0], ks[1], input_size, hidden_size)
    w2, b2 = lin(ks[2], ks[3], hidden_size, hidden_size)
    w3, b3 = lin(ks[4], ks[5], hidden_size, output_size)
    return {"w1": w1, "b1": b1, "w2": w2, "b2": b2, "w3": w3, "b3": b3}


def actor_reference(state, params):
    """Pure-JAX f32 reference mirroring the PyTorch Actor forward."""
    hp = jax.lax.Precision.HIGHEST

    def layer_norm(x):
        mu = jnp.mean(x, axis=-1, keepdims=True)
        var = jnp.mean(jnp.square(x - mu), axis=-1, keepdims=True)
        return (x - mu) / jnp.sqrt(var + LN_EPS)

    h = jnp.dot(state, params["w1"].T, precision=hp) + params["b1"][:, 0]
    h = layer_norm(jnp.maximum(h, 0.0))
    h = jnp.dot(h, params["w2"].T, precision=hp) + params["b2"][:, 0]
    h = layer_norm(jnp.maximum(h, 0.0))
    return jnp.tanh(jnp.dot(h, params["w3"].T, precision=hp) + params["b3"][:, 0])


if __name__ == "__main__":
    batch, input_size, hidden_size, output_size = 4, 16, 32, 8

    key = jax.random.PRNGKey(0)
    k_state, k_params = jax.random.split(key)
    state = jax.random.normal(k_state, (batch, input_size), jnp.float32)
    params = init_params(k_params, input_size, hidden_size, output_size)

    out = jax.block_until_ready(actor_forward(state, params))
    ref = actor_reference(state, params)

    assert out.shape == (batch, output_size), out.shape
    max_err = float(jnp.max(jnp.abs(out - ref)))
    assert jnp.allclose(out, ref, atol=1e-3, rtol=1e-3), f"max abs err {max_err}"
    print("KERNEL_OK")
</pallas_src>

<mosaic_0001>
module attributes {stable_mosaic.version = 11 : i64} {
  func.func @actor_kernel(%arg0: i32, %arg1: memref<128x16xf32, #tpu.memory_space<vmem>>, %arg2: memref<32x16xf32, #tpu.memory_space<vmem>>, %arg3: memref<32x1xf32, #tpu.memory_space<vmem>>, %arg4: memref<32x32xf32, #tpu.memory_space<vmem>>, %arg5: memref<32x1xf32, #tpu.memory_space<vmem>>, %arg6: memref<8x32xf32, #tpu.memory_space<vmem>>, %arg7: memref<8x1xf32, #tpu.memory_space<vmem>>, %arg8: memref<8x128xf32, #tpu.memory_space<vmem>>) attributes {dimension_semantics = [#tpu.dimension_semantics<parallel>], iteration_bounds = array<i64: 1>, scalar_prefetch = 0 : i64, scratch_operands = 0 : i64, tpu.core_type = #tpu.core_type<tc>, window_params = [{transform_indices = @transform_0, window_bounds = array<i64: 128, 16>}, {pipeline_mode = #tpu.pipeline_mode<synchronous>, transform_indices = @transform_1, window_bounds = array<i64: 32, 16>}, {pipeline_mode = #tpu.pipeline_mode<synchronous>, transform_indices = @transform_2, window_bounds = array<i64: 32, 1>}, {pipeline_mode = #tpu.pipeline_mode<synchronous>, transform_indices = @transform_3, window_bounds = array<i64: 32, 32>}, {pipeline_mode = #tpu.pipeline_mode<synchronous>, transform_indices = @transform_4, window_bounds = array<i64: 32, 1>}, {pipeline_mode = #tpu.pipeline_mode<synchronous>, transform_indices = @transform_5, window_bounds = array<i64: 8, 32>}, {pipeline_mode = #tpu.pipeline_mode<synchronous>, transform_indices = @transform_6, window_bounds = array<i64: 8, 1>}, {transform_indices = @transform_7, window_bounds = array<i64: 8, 128>}]} {
    %c0 = arith.constant 0 : index
    %c0_0 = arith.constant 0 : index
    %0 = vector.load %arg2[%c0, %c0_0] : memref<32x16xf32, #tpu.memory_space<vmem>>, vector<32x16xf32>
    %c0_1 = arith.constant 0 : index
    %c0_2 = arith.constant 0 : index
    %1 = vector.load %arg1[%c0_1, %c0_2] : memref<128x16xf32, #tpu.memory_space<vmem>>, vector<128x16xf32>
    %cst = arith.constant dense<0.000000e+00> : vector<32x128xf32>
    %2 = tpu.matmul %0, %1, %cst {dimension_numbers = #tpu.dot_dimension_numbers<[1], [1], [0], [0], [0, 0, 1, 0], [], []>} : vector<32x16xf32>, vector<128x16xf32>, vector<32x128xf32> -> vector<32x128xf32>
    %c0_3 = arith.constant 0 : index
    %c0_4 = arith.constant 0 : index
    %3 = vector.load %arg3[%c0_3, %c0_4] : memref<32x1xf32, #tpu.memory_space<vmem>>, vector<32x1xf32>
    %4 = vector.broadcast %3 : vector<32x1xf32> to vector<32x128xf32>
    %5 = arith.addf %2, %4 : vector<32x128xf32>
    %cst_5 = arith.constant 0.000000e+00 : f32
    %6 = vector.broadcast %cst_5 : f32 to vector<32x128xf32>
    %7 = arith.maximumf %5, %6 : vector<32x128xf32>
    %cst_6 = arith.constant dense<0.000000e+00> : vector<128xf32>
    %8 = vector.multi_reduction <add>, %7, %cst_6 [0] : vector<32x128xf32> to vector<128xf32>
    %9 = vector.shape_cast %8 : vector<128xf32> to vector<1x128xf32>
    %10 = arith.mulf %7, %7 : vector<32x128xf32>
    %cst_7 = arith.constant dense<0.000000e+00> : vector<128xf32>
    %11 = vector.multi_reduction <add>, %10, %cst_7 [0] : vector<32x128xf32> to vector<128xf32>
    %12 = vector.shape_cast %11 : vector<128xf32> to vector<1x128xf32>
    %cst_8 = arith.constant 3.125000e-02 : f32
    %13 = vector.broadcast %cst_8 : f32 to vector<1x128xf32>
    %14 = arith.mulf %9, %13 : vector<1x128xf32>
    %cst_9 = arith.constant 3.125000e-02 : f32
    %15 = vector.broadcast %cst_9 : f32 to vector<1x128xf32>
    %16 = arith.mulf %12, %15 : vector<1x128xf32>
    %17 = arith.mulf %14, %14 : vector<1x128xf32>
    %18 = arith.subf %16, %17 : vector<1x128xf32>
    %cst_10 = arith.constant 0.000000e+00 : f32
    %19 = vector.broadcast %cst_10 : f32 to vector<1x128xf32>
    %20 = arith.maximumf %18, %19 : vector<1x128xf32>
    %21 = vector.broadcast %14 : vector<1x128xf32> to vector<32x128xf32>
    %22 = arith.subf %7, %21 : vector<32x128xf32>
    %cst_11 = arith.constant 9.99999974E-6 : f32
    %23 = vector.broadcast %cst_11 : f32 to vector<1x128xf32>
    %24 = arith.addf %20, %23 : vector<1x128xf32>
    %25 = math.rsqrt %24 : vector<1x128xf32>
    %26 = vector.broadcast %25 : vector<1x128xf32> to vector<32x128xf32>
    %27 = arith.mulf %22, %26 : vector<32x128xf32>
    %c0_12 = arith.constant 0 : index
    %c0_13 = arith.constant 0 : index
    %28 = vector.load %arg4[%c0_12, %c0_13] : memref<32x32xf32, #tpu.memory_space<vmem>>, vector<32x32xf32>
    %cst_14 = arith.constant dense<0.000000e+00> : vector<32x128xf32>
    %29 = tpu.matmul %28, %27, %cst_14 {dimension_numbers = #tpu.dot_dimension_numbers<[1], [0], [0], [1], [0, 0, 1, 1], [], []>} : vector<32x32xf32>, vector<32x128xf32>, vector<32x128xf32> -> vector<32x128xf32>
    %c0_15 = arith.constant 0 : index
    %c0_16 = arith.constant 0 : index
    %30 = vector.load %arg5[%c0_15, %c0_16] : memref<32x1xf32, #tpu.memory_space<vmem>>, vector<32x1xf32>
    %31 = vector.broadcast %30 : vector<32x1xf32> to vector<32x128xf32>
    %32 = arith.addf %29, %31 : vector<32x128xf32>
    %cst_17 = arith.constant 0.000000e+00 : f32
    %33 = vector.broadcast %cst_17 : f32 to vector<32x128xf32>
    %34 = arith.maximumf %32, %33 : vector<32x128xf32>
    %cst_18 = arith.constant dense<0.000000e+00> : vector<128xf32>
    %35 = vector.multi_reduction <add>, %34, %cst_18 [0] : vector<32x128xf32> to vector<128xf32>
    %36 = vector.shape_cast %35 : vector<128xf32> to vector<1x128xf32>
    %37 = arith.mulf %34, %34 : vector<32x128xf32>
    %cst_19 = arith.constant dense<0.000000e+00> : vector<128xf32>
    %38 = vector.multi_reduction <add>, %37, %cst_19 [0] : vector<32x128xf32> to vector<128xf32>
    %39 = vector.shape_cast %38 : vector<128xf32> to vector<1x128xf32>
    %cst_20 = arith.constant 3.125000e-02 : f32
    %40 = vector.broadcast %cst_20 : f32 to vector<1x128xf32>
    %41 = arith.mulf %36, %40 : vector<1x128xf32>
    %cst_21 = arith.constant 3.125000e-02 : f32
    %42 = vector.broadcast %cst_21 : f32 to vector<1x128xf32>
    %43 = arith.mulf %39, %42 : vector<1x128xf32>
    %44 = arith.mulf %41, %41 : vector<1x128xf32>
    %45 = arith.subf %43, %44 : vector<1x128xf32>
    %cst_22 = arith.constant 0.000000e+00 : f32
    %46 = vector.broadcast %cst_22 : f32 to vector<1x128xf32>
    %47 = arith.maximumf %45, %46 : vector<1x128xf32>
    %48 = vector.broadcast %41 : vector<1x128xf32> to vector<32x128xf32>
    %49 = arith.subf %34, %48 : vector<32x128xf32>
    %cst_23 = arith.constant 9.99999974E-6 : f32
    %50 = vector.broadcast %cst_23 : f32 to vector<1x128xf32>
    %51 = arith.addf %47, %50 : vector<1x128xf32>
    %52 = math.rsqrt %51 : vector<1x128xf32>
    %53 = vector.broadcast %52 : vector<1x128xf32> to vector<32x128xf32>
    %54 = arith.mulf %49, %53 : vector<32x128xf32>
    %c0_24 = arith.constant 0 : index
    %c0_25 = arith.constant 0 : index
    %55 = vector.load %arg6[%c0_24, %c0_25] : memref<8x32xf32, #tpu.memory_space<vmem>>, vector<8x32xf32>
    %cst_26 = arith.constant dense<0.000000e+00> : vector<8x128xf32>
    %56 = tpu.matmul %55, %54, %cst_26 {dimension_numbers = #tpu.dot_dimension_numbers<[1], [0], [0], [1], [0, 0, 1, 1], [], []>} : vector<8x32xf32>, vector<32x128xf32>, vector<8x128xf32> -> vector<8x128xf32>
    %c0_27 = arith.constant 0 : index
    %c0_28 = arith.constant 0 : index
    %57 = vector.load %arg7[%c0_27, %c0_28] : memref<8x1xf32, #tpu.memory_space<vmem>>, vector<8x1xf32>
    %58 = vector.broadcast %57 : vector<8x1xf32> to vector<8x128xf32>
    %59 = arith.addf %56, %58 : vector<8x128xf32>
    %60 = math.tanh %59 : vector<8x128xf32>
    %c0_29 = arith.constant 0 : index
    %c0_30 = arith.constant 0 : index
    %61 = vector.load %arg8[%c0_29, %c0_30] : memref<8x128xf32, #tpu.memory_space<vmem>>, vector<8x128xf32>
    tpu.vector_store %arg8[%c0_29, %c0_30], %60 {strides = array<i32>} : memref<8x128xf32, #tpu.memory_space<vmem>>, vector<8x128xf32>,
    return
  }
  func.func @transform_0(%arg0: i32) -> (i32, i32) {
    %c0_i32 = arith.constant 0 : i32
    %c0_i32_0 = arith.constant 0 : i32
    return %arg0, %c0_i32 : i32, i32
  }
  func.func @transform_1(%arg0: i32) -> (i32, i32) {
    %c0_i32 = arith.constant 0 : i32
    %c0_i32_0 = arith.constant 0 : i32
    %c0_i32_1 = arith.constant 0 : i32
    return %c0_i32, %c0_i32_0 : i32, i32
  }
  func.func @transform_2(%arg0: i32) -> (i32, i32) {
    %c0_i32 = arith.constant 0 : i32
    %c0_i32_0 = arith.constant 0 : i32
    %c0_i32_1 = arith.constant 0 : i32
    return %c0_i32, %c0_i32_0 : i32, i32
  }
  func.func @transform_3(%arg0: i32) -> (i32, i32) {
    %c0_i32 = arith.constant 0 : i32
    %c0_i32_0 = arith.constant 0 : i32
    %c0_i32_1 = arith.constant 0 : i32
    return %c0_i32, %c0_i32_0 : i32, i32
  }
  func.func @transform_4(%arg0: i32) -> (i32, i32) {
    %c0_i32 = arith.constant 0 : i32
    %c0_i32_0 = arith.constant 0 : i32
    %c0_i32_1 = arith.constant 0 : i32
    return %c0_i32, %c0_i32_0 : i32, i32
  }
  func.func @transform_5(%arg0: i32) -> (i32, i32) {
    %c0_i32 = arith.constant 0 : i32
    %c0_i32_0 = arith.constant 0 : i32
    %c0_i32_1 = arith.constant 0 : i32
    return %c0_i32, %c0_i32_0 : i32, i32
  }
  func.func @transform_6(%arg0: i32) -> (i32, i32) {
    %c0_i32 = arith.constant 0 : i32
    %c0_i32_0 = arith.constant 0 : i32
    %c0_i32_1 = arith.constant 0 : i32
    return %c0_i32, %c0_i32_0 : i32, i32
  }
  func.func @transform_7(%arg0: i32) -> (i32, i32) {
    %c0_i32 = arith.constant 0 : i32
    %c0_i32_0 = arith.constant 0 : i32
    return %c0_i32, %arg0 : i32, i32
  }
}

</mosaic_0001>

<bundles_post_ra>
// kernel: tpu_custom_call.1
= control target key start
LH: loop header
LB: loop body
LE: loop exit
PB: predicated region body
PF: predicated region fallthrough
CT: control target
= control target key end

     0   :  { %vm71_vm0 = vcmask 130048   ;;  %v676_v2 = vmov 0   ;;  %s871_s0 = inlined_call_operand.vmem [shape: f32[128,16], index: 0, kind: input, shape index: {}]   ;;  %s872_s1 = inlined_call_operand.vmem [shape: f32[32,16], index: 1, kind: input, shape index: {}]   ;;  %s873_s2 = inlined_call_operand.vmem [shape: f32[32,1], index: 2, kind: input, shape index: {}]   ;;  %s874_s3 = inlined_call_operand.vmem [shape: f32[32,32], index: 3, kind: input, shape index: {}]   ;;  %s875_s4 = inlined_call_operand.vmem [shape: f32[32,1], index: 4, kind: input, shape index: {}]   ;;  %s876_s5 = inlined_call_operand.vmem [shape: f32[8,32], index: 5, kind: input, shape index: {}]   ;;  %s877_s6 = inlined_call_operand.vmem [shape: f32[8,1], index: 6, kind: input, shape index: {}]   ;;  %s878_s7 = inlined_call_operand.hbm [shape: f32[8,128], index: 7, kind: output, shape index: {}]  }
   0x1   :  { %v46_v0 = vld [vmem:[%s871_s0 + $0x78] sm:$0xff]  ;;  %v45_v1 = vld [vmem:[%s871_s0 + $0x70] sm:$0xff]  ;;  %646 = vset.pattern.permute.xlu0 %v676_v2  ;;  %647 = vset.pattern.permute.xlu1 %v676_v2  ;;  %v44_v3 = vld [vmem:[%s871_s0 + $0x68] sm:$0xff] }
   0x2   :  { %579 = vmatprep.subr.msk.mxu0 %vm71_vm0, %v46_v0  ;;  %v27_v4 = vld [vmem:[%s872_s1] sm:$0xff]  ;;  %v49_v6 = vld [vmem:[%s873_s2 + $0x10] sm:$0xff]  ;;  %v48_v8 = vld [vmem:[%s873_s2 + $0x8] sm:$0xff] }
   0x3   :  { %580 = vmatpush3.xpose.msk.msra.mxu0 %vm71_vm0, %v46_v0  ;;  %611 = vmatprep.mubr.msk.f32.mxu0 %vm71_vm0, %v27_v4  ;;  %v47_v5 = vld [vmem:[%s873_s2] sm:$0xff]  ;;  %v50_v9 = vld [vmem:[%s873_s2 + $0x18] sm:$0xff] }
   0x4   :  { %581 = vmatprep.subr.msk.mxu0 %vm71_vm0, %v45_v1  ;;  %53 = vperm.xlu0 %646, %v47_v5   ;;  %v43_v7 = vld [vmem:[%s871_s0 + $0x60] sm:$0xff] }
   0x5   :  { %63 = vperm.xlu1 %647, %v49_v6  }
   0x7   :  { %582 = vmatpush3.xpose.msk.msra.mxu0 %vm71_vm0, %v45_v1 }
   0x8   :  { %583 = vmatprep.subr.msk.mxu0 %vm71_vm0, %v44_v3 }
   0x9   :  { %12 = vsyncpa [#allocation3], 0  ;;  %58 = vperm.xlu0 %646, %v48_v8   ;;  %v42_v10 = vld [vmem:[%s871_s0 + $0x58] sm:$0xff]  ;;  %v262_v11 = vld [vmem:[%s875_s4] sm:$0xff]  ;;  %68 = vperm.xlu1 %647, %v50_v9   ;;  %vm286_vm1 = vcmask 261120   ;;  %vm678_vm2 = vmmov 0  }
   0xa   :  { %v263_v12 = vld [vmem:[%s875_s4 + $0x8] sm:$0xff]  ;;  %v41_v13 = vld [vmem:[%s871_s0 + $0x50] sm:$0xff]  ;;  %v265_v15 = vld [vmem:[%s875_s4 + $0x18] sm:$0xff]  ;;  %s679_s14 = smov [#allocation2]  }
   0xb   :  { %584 = vmatpush3.xpose.msk.msra.mxu0 %vm71_vm0, %v44_v3  ;;  %v264_v14 = vld [vmem:[%s875_s4 + $0x10] sm:$0xff]  ;;  %v40_v16 = vld [vmem:[%s871_s0 + $0x48] sm:$0xff]  ;;  %v426_v17 = vld [vmem:[%s877_s6] sm:$0xff]  ;;  %s513_s15 = sshll.u32 %s679_s14, 4  ;;  %s514_s15 = int_to_ptr.vmem [resolvable:$true] %s513_s15 }
   0xc   :  { %585 = vmatprep.subr.msk.mxu0 %vm71_vm0, %v43_v7  ;;  %v39_v18 = vld [vmem:[%s871_s0 + $0x40] sm:$0xff]  ;;  %v38_v19 = vld [vmem:[%s871_s0 + $0x38] sm:$0xff]  ;;  %v37_v20 = vld [vmem:[%s871_s0 + $0x30] sm:$0xff]  ;;  %s654_s16 = scalar_lea.vmem %s514_s15, 128  ;;  %p659_p1 = scmp.lt.s32.totalorder %s514_s15, %s514_s15 }
   0xd   :  { %268 = vperm.xlu0 %646, %v262_v11   ;;  %273 = vperm.xlu1 %647, %v263_v12   ;;  %v36_v21 = vld [vmem:[%s871_s0 + $0x28] sm:$0xff]  ;;  %v35_v22 = vld [vmem:[%s871_s0 + $0x20] sm:$0xff]  ;;  %v34_v23 = vld [vmem:[%s871_s0 + $0x18] sm:$0xff]  ;;  %p655_p0 = scmp.ne.s32.totalorder %s514_s15, %s654_s16  ;;  %p660_p2 = scmp.lt.s32.totalorder %s654_s16, %s654_s16 }
   0xe   :  { %v33_v24 = vld [vmem:[%s871_s0 + $0x10] sm:$0xff]  ;;  %v32_v25 = vld [vmem:[%s871_s0 + $0x8] sm:$0xff]  ;;  %v31_v26 = vld [vmem:[%s871_s0] sm:$0xff] }
   0xf   :  { %586 = vmatpush3.xpose.msk.msra.mxu0 %vm71_vm0, %v43_v7  ;;  %v28_v27 = vld [vmem:[%s872_s1 + $0x8] sm:$0xff]  ;;  %v29_v28 = vld [vmem:[%s872_s1 + $0x10] sm:$0xff]  ;;  %v30_v29 = vld [vmem:[%s872_s1 + $0x18] sm:$0xff]  ;;  %p661_p3 = por %p660_p2, %p659_p1 }
  0x10   :  { %587 = vmatprep.subr.msk.mxu0 %vm71_vm0, %v42_v10  ;;  %v258_v30 = vld [vmem:[%s874_s3] sm:$0xff] }
  0x11   :  { %278 = vperm.xlu0 %646, %v264_v14   ;;  %283 = vperm.xlu1 %647, %v265_v15   ;;  %p662_p4 = pnand %p661_p3, %p655_p0 }
  0x12   :  { %625 = vmatprep.mubr.msk.f32.mxu1 %vm286_vm1, %v258_v30 }
  0x13   :  { %588 = vmatpush3.xpose.msk.msra.mxu0 %vm71_vm0, %v42_v10 }
  0x14   :  { %589 = vmatprep.subr.msk.mxu0 %vm71_vm0, %v41_v13 }
  0x15   :  { %429 = vperm.xlu0 %646, %v426_v17  }
  0x17   :  { %590 = vmatpush3.xpose.msk.msra.mxu0 %vm71_vm0, %v41_v13 }
  0x18   :  { %591 = vmatprep.subr.msk.mxu0 %vm71_vm0, %v40_v16 }
  0x1b   :  { %592 = vmatpush3.xpose.msk.msra.mxu0 %vm71_vm0, %v40_v16 }
  0x1c   :  { %593 = vmatprep.subr.msk.mxu0 %vm71_vm0, %v39_v18 }
  0x1f   :  { %594 = vmatpush3.xpose.msk.msra.mxu0 %vm71_vm0, %v39_v18 }
  0x20   :  { %595 = vmatprep.subr.msk.mxu0 %vm71_vm0, %v38_v19 }
  0x23   :  { %596 = vmatpush3.xpose.msk.msra.mxu0 %vm71_vm0, %v38_v19 }
  0x24   :  { %597 = vmatprep.subr.msk.mxu0 %vm71_vm0, %v37_v20 }
  0x27   :  { %598 = vmatpush3.xpose.msk.msra.mxu0 %vm71_vm0, %v37_v20  ;;  %v259_v20 = vld [vmem:[%s874_s3 + $0x8] sm:$0xff] }
  0x28   :  { %599 = vmatprep.subr.msk.mxu0 %vm71_vm0, %v36_v21 }
  0x2b   :  { %600 = vmatpush3.xpose.msk.msra.mxu0 %vm71_vm0, %v36_v21  ;;  %v260_v21 = vld [vmem:[%s874_s3 + $0x10] sm:$0xff] }
  0x2c   :  { %601 = vmatprep.subr.msk.mxu0 %vm71_vm0, %v35_v22 }
  0x2f   :  { %602 = vmatpush3.xpose.msk.msra.mxu0 %vm71_vm0, %v35_v22  ;;  %v261_v22 = vld [vmem:[%s874_s3 + $0x18] sm:$0xff] }
  0x30   :  { %603 = vmatprep.subr.msk.mxu0 %vm71_vm0, %v34_v23 }
  0x33   :  { %604 = vmatpush3.xpose.msk.msra.mxu0 %vm71_vm0, %v34_v23  ;;  %v677_v23 = vmov 0.0  }
  0x34   :  { %605 = vmatprep.subr.msk.mxu0 %vm71_vm0, %v33_v24 }
  0x37   :  { %606 = vmatpush3.xpose.msk.msra.mxu0 %vm71_vm0, %v33_v24 }
  0x38   :  { %607 = vmatprep.subr.msk.mxu0 %vm71_vm0, %v32_v25 }
  0x3b   :  { %608 = vmatpush3.xpose.msk.msra.mxu0 %vm71_vm0, %v32_v25 }
  0x3c   :  { %609 = vmatprep.subr.msk.mxu0 %vm71_vm0, %v31_v26 }
  0x3f   :  { %610 = vmatpush3.xpose.msk.msra.mxu0 %vm71_vm0, %v31_v26 }
  0x42   :  { %612 = vmatmul.mubr.msk.f32.vlgmr.msra.gmra.mxu0 %vm71_vm0, %v28_v27 }
  0x43   :  { %614 = vmatprep.mubr.msk.f32.mxu0 %vm71_vm0, %v29_v28 }
  0x46   :  { %615 = vmatmul.mubr.msk.f32.gmra.mxu0 %vm71_vm0, %v30_v29 }
  0x7f   :  { %v54_v31 = vpop.permute.xlu0 %53 }
  0x80   :  { %v64_v32 = vpop.permute.xlu1 %63 }
  0x84   :  { %v59_v33 = vpop.permute.xlu0 %58  ;;  %v69_v38 = vpop.permute.xlu1 %68 }
  0x88   :  { %v274_v24 = vpop.permute.xlu1 %273  ;;  %v269_v25 = vpop.permute.xlu0 %268 }
  0x8c   :  { %v284_v30 = vpop.permute.xlu1 %283 }
 0x102   :  { %v613_v34 = vpop.f32.mrf.mxu0 }
 0x103   :  { %v204_v35 = vadd.f32 %v613_v34, %v59_v33 }
 0x104   :  { %v198_v36 = vpop.f32.mrf.mxu0 }
 0x105   :  { %v199_v37 = vadd.f32 %v198_v36, %v54_v31  ;;  %v218_v40 = vmax.f32 %v204_v35, 0.0  ;;  %v279_v35 = vpop.permute.xlu0 %278 }
 0x106   :  { %v616_v39 = vpop.f32.mrf.mxu0 }
 0x107   :  { %v217_v41 = vmax.f32 %v199_v37, 0.0  ;;  %v214_v42 = vadd.f32 %v616_v39, %v69_v38  ;;  %v231_v46 = vmul.f32 %v218_v40, %v218_v40 }
 0x108   :  { %v208_v43 = vpop.f32.mrf.mxu0 }
 0x109   :  { %v230_v44 = vmul.f32 %v217_v41, %v217_v41  ;;  %v209_v45 = vadd.f32 %v208_v43, %v64_v32  ;;  %v221_v47 = vadd.f32 %v218_v40, %v217_v41  ;;  %v220_v48 = vmax.f32 %v214_v42, 0.0 }
 0x10b   :  { %v219_v49 = vmax.f32 %v209_v45, 0.0  ;;  %v234_v50 = vadd.f32 %v231_v46, %v230_v44  ;;  %v233_v53 = vmul.f32 %v220_v48, %v220_v48 }
 0x10d   :  { %v222_v51 = vadd.f32 %v221_v47, %v219_v49  ;;  %v232_v52 = vmul.f32 %v219_v49, %v219_v49 }
 0x10f   :  { %v223_v54 = vadd.f32 %v222_v51, %v220_v48  ;;  %v235_v55 = vadd.f32 %v234_v50, %v232_v52 }
 0x111   :  { %v224_v56 = vrot.slane %v223_v54, 4  ;;  %v236_v57 = vadd.f32 %v235_v55, %v233_v53 }
 0x113   :  { %v225_v58 = vadd.f32 %v224_v56, %v223_v54  ;;  %v237_v59 = vrot.slane %v236_v57, 4 }
 0x115   :  { %v226_v60 = vrot.slane %v225_v58, 2  ;;  %v238_v61 = vadd.f32 %v237_v59, %v236_v57 }
 0x117   :  { %v227_v62 = vadd.f32 %v226_v60, %v225_v58  ;;  %v239_v63 = vrot.slane %v238_v61, 2 }
 0x119   :  { %v228_v0 = vrot.slane %v227_v62, 1  ;;  %v240_v1 = vadd.f32 %v239_v63, %v238_v61 }
 0x11b   :  { %v229_v2 = vadd.f32 %v228_v0, %v227_v62  ;;  %v241_v3 = vrot.slane %v240_v1, 1 }
 0x11d   :  { %v242_v4 = vadd.f32 %v241_v3, %v240_v1  ;;  %v243_v5 = vmul.f32 0.03125, %v229_v2 }
 0x11f   :  { %v244_v6 = vmul.f32 0.03125, %v242_v4  ;;  %v245_v7 = vmul.f32 %v243_v5, %v243_v5  ;;  %v251_v11 = vsub.f32 %v220_v48, %v243_v5  ;;  %v250_v13 = vsub.f32 %v219_v49, %v243_v5 }
 0x120   :  { %v249_v16 = vsub.f32 %v218_v40, %v243_v5  ;;  %v248_v18 = vsub.f32 %v217_v41, %v243_v5 }
 0x121   :  { %v246_v8 = vsub.f32 %v244_v6, %v245_v7 }
 0x123   :  { %v247_v9 = vmax.f32 %v246_v8, 0.0 }
 0x125   :  { %v252_v10 = vadd.f32 1e-05, %v247_v9 }
 0x127   :  { %648 = vrsqrt.f32 %v252_v10 }
 0x134   :  { %v649_v12 = vpop.eup %648 }
 0x135   :  { %v257_v14 = vmul.f32 %v649_v12, %v251_v11  ;;  %v256_v15 = vmul.f32 %v649_v12, %v250_v13  ;;  %v255_v17 = vmul.f32 %v649_v12, %v249_v16  ;;  %v254_v19 = vmul.f32 %v649_v12, %v248_v18  ;;  %v425_v13 = vld [vmem:[%s876_s5] sm:$0xff] }
 0x137   :  { %617 = vmatprep.subr.mxu1 %v257_v14 }
 0x138   :  { %618 = vmatpush3.msra.mxu1 %v257_v14  ;;  %v430_v14 = vpop.permute.xlu0 %429 }
 0x139   :  { %619 = vmatprep.subr.mxu1 %v256_v15 }
 0x13a   :  { %620 = vmatpush3.msra.mxu1 %v256_v15 }
 0x13b   :  { %621 = vmatprep.subr.mxu1 %v255_v17 }
 0x13c   :  { %622 = vmatpush3.msra.mxu1 %v255_v17 }
 0x13d   :  { %623 = vmatprep.subr.mxu1 %v254_v19 }
 0x13e   :  { %624 = vmatpush3.msra.mxu1 %v254_v19 }
 0x13f   :  { %626 = vmatmul.mubr.msk.f32.vlgmr.msra.gmra.mxu1 %vm286_vm1, %v259_v20  ;;  %631 = vmatprep.subr.mxu1 %v677_v23 }
 0x140   :  { %628 = vmatprep.mubr.msk.f32.mxu1 %vm286_vm1, %v260_v21 }
 0x143   :  { %629 = vmatmul.mubr.msk.f32.gmra.mxu1 %vm286_vm1, %v261_v22 }
 0x144   :  { %639 = vmatprep.mubr.msk.f32.mxu1 %vm678_vm2, %v677_v23 }
 0x1ff   :  { %v627_v26 = vpop.f32.mrf.mxu1 }
 0x200   :  { %v371_v27 = vadd.f32 %v627_v26, %v274_v24 }
 0x201   :  { %v365_v28 = vpop.f32.mrf.mxu1 }
 0x202   :  { %v366_v29 = vadd.f32 %v365_v28, %v269_v25  ;;  %v385_v32 = vmax.f32 %v371_v27, 0.0 }
 0x203   :  { %v630_v31 = vpop.f32.mrf.mxu1 }
 0x204   :  { %v384_v33 = vmax.f32 %v366_v29, 0.0  ;;  %v381_v34 = vadd.f32 %v630_v31, %v284_v30  ;;  %v398_v39 = vmul.f32 %v385_v32, %v385_v32 }
 0x205   :  { %v375_v36 = vpop.f32.mrf.mxu1 }
 0x206   :  { %v397_v37 = vmul.f32 %v384_v33, %v384_v33  ;;  %v376_v38 = vadd.f32 %v375_v36, %v279_v35  ;;  %v388_v40 = vadd.f32 %v385_v32, %v384_v33  ;;  %v387_v41 = vmax.f32 %v381_v34, 0.0 }
 0x208   :  { %v386_v42 = vmax.f32 %v376_v38, 0.0  ;;  %v401_v43 = vadd.f32 %v398_v39, %v397_v37  ;;  %v400_v46 = vmul.f32 %v387_v41, %v387_v41 }
 0x20a   :  { %v389_v44 = vadd.f32 %v388_v40, %v386_v42  ;;  %v399_v45 = vmul.f32 %v386_v42, %v386_v42 }
 0x20c   :  { %v390_v47 = vadd.f32 %v389_v44, %v387_v41  ;;  %v402_v48 = vadd.f32 %v401_v43, %v399_v45 }
 0x20e   :  { %v391_v49 = vrot.slane %v390_v47, 4  ;;  %v403_v50 = vadd.f32 %v402_v48, %v400_v46 }
 0x210   :  { %v392_v51 = vadd.f32 %v391_v49, %v390_v47  ;;  %v404_v52 = vrot.slane %v403_v50, 4 }
 0x212   :  { %v393_v53 = vrot.slane %v392_v51, 2  ;;  %v405_v54 = vadd.f32 %v404_v52, %v403_v50 }
 0x214   :  { %v394_v55 = vadd.f32 %v393_v53, %v392_v51  ;;  %v406_v56 = vrot.slane %v405_v54, 2 }
 0x216   :  { %v395_v57 = vrot.slane %v394_v55, 1  ;;  %v407_v58 = vadd.f32 %v406_v56, %v405_v54 }
 0x218   :  { %v396_v59 = vadd.f32 %v395_v57, %v394_v55  ;;  %v408_v60 = vrot.slane %v407_v58, 1 }
 0x21a   :  { %v409_v61 = vadd.f32 %v408_v60, %v407_v58  ;;  %v410_v62 = vmul.f32 0.03125, %v396_v59 }
 0x21c   :  { %v411_v63 = vmul.f32 0.03125, %v409_v61  ;;  %v412_v0 = vmul.f32 %v410_v62, %v410_v62  ;;  %v418_v4 = vsub.f32 %v387_v41, %v410_v62  ;;  %v417_v6 = vsub.f32 %v386_v42, %v410_v62 }
 0x21d   :  { %v416_v9 = vsub.f32 %v385_v32, %v410_v62  ;;  %v415_v11 = vsub.f32 %v384_v33, %v410_v62 }
 0x21e   :  { %v413_v1 = vsub.f32 %v411_v63, %v412_v0 }
 0x220   :  { %v414_v2 = vmax.f32 %v413_v1, 0.0 }
 0x222   :  { %v419_v3 = vadd.f32 1e-05, %v414_v2 }
 0x224   :  { %650 = vrsqrt.f32 %v419_v3 }
 0x231   :  { %v651_v5 = vpop.eup %650 }
 0x232   :  { %v424_v7 = vmul.f32 %v651_v5, %v418_v4  ;;  %v423_v8 = vmul.f32 %v651_v5, %v417_v6  ;;  %v422_v10 = vmul.f32 %v651_v5, %v416_v9  ;;  %v421_v12 = vmul.f32 %v651_v5, %v415_v11 }
 0x234   :  { %632 = vmatpush3.msra.mxu1 %v424_v7 }
 0x235   :  { %633 = vmatprep.subr.mxu1 %v677_v23 }
 0x236   :  { %634 = vmatpush3.msra.mxu1 %v423_v8 }
 0x237   :  { %635 = vmatprep.subr.mxu1 %v677_v23 }
 0x238   :  { %636 = vmatpush3.msra.mxu1 %v422_v10 }
 0x239   :  { %637 = vmatprep.subr.mxu1 %v677_v23 }
 0x23a   :  { %638 = vmatpush3.msra.mxu1 %v421_v12 }
 0x23b   :  { %640 = vmatmul.mubr.msk.f32.vlgmr.msra.gmra.mxu1 %vm286_vm1, %v425_v13 }
 0x2fb   :  { %v501_v15 = vpop.f32.mrf.mxu1 }
 0x2fc   :  { %v502_v16 = vadd.f32 %v501_v15, %v430_v14 }
 0x2fd   :  { %v641_v17 = vpop.f32.mrf.mxu1 }
 0x2fe   :  { %652 = vtanh.f32 %v502_v16 }
 0x30b   :  { %v653_v18 = vpop.eup %652 }
 0x30c   :  { %506 = vst [vmem:[#allocation2] sm:$0xff] %v653_v18 }
 0x30d   :  { %665 = shalt.err (!%p662_p4)
}
 0x30e   :  { %516 = dma.vmem_to_hbm [thread:$0]  %s514_s15, 128, %s878_s7, [#allocation3]  }
 0x30f   :  { %674 = dma.done.wait [#allocation3], 128  }
 0x310   :  { %675 = vsyncadd [#allocation3], 4294967168 }
 0x311   :  { %520 = vsyncpa [#allocation3], 1 }

</bundles_post_ra>
